<compile_context>
chip_gen: v7x
topology: tpu7x:2x2x1
jax: 0.10.0
libtpu: 0.0.40
codegen_flags: <defaults>
</compile_context>

<pallas_src>
import functools

import jax
import jax.numpy as jnp
from jax import lax
from jax.experimental import pallas as pl
from jax.experimental.pallas import tpu as pltpu

EPS = 1e-5  # torch.nn.LayerNorm default


def _round_up(x, m):
    return ((x + m - 1) // m) * m


def _round_down(x, m):
    return (x // m) * m


def prenorm_kernel(x_ref, gamma_ref, beta_ref, w_ref, wb_ref, o_ref):
    # x_ref: (TM, D) tile of flattened (batch*seq, dim) tokens.
    x = x_ref[...].astype(jnp.float32)

    # --- LayerNorm over last dim (biased variance, matches torch.nn.LayerNorm) ---
    mean = jnp.mean(x, axis=-1, keepdims=True)
    centered = x - mean
    var = jnp.mean(centered * centered, axis=-1, keepdims=True)
    xn = centered * lax.rsqrt(var + EPS)
    # gamma/beta are (1, D); implicit row-broadcast (loop-invariant; VPU work
    # hidden under the MXU matmul below).
    y = xn * gamma_ref[...].astype(jnp.float32) + beta_ref[...].astype(jnp.float32)

    # --- fn: Linear(dim, dim) on the MXU ---
    # Run the matmul in the weight's native dtype (bf16 MXU path when W is
    # bf16), always accumulating in f32.
    # TODO(synk): `fn` in PreNorm is arbitrary; a Linear(dim, dim) stands in here.
    out = jnp.dot(y.astype(w_ref.dtype), w_ref[...],
                  preferred_element_type=jnp.float32)
    out = out + wb_ref[...].astype(jnp.float32)

    o_ref[...] = out.astype(o_ref.dtype)


@functools.partial(jax.jit, static_argnames=("tm",))
def prenorm_linear(x, gamma, beta, w, wb, *, tm=512):
    """x: (B, N, D).  Returns fn(LayerNorm(x)) with fn = Linear(D, D)."""
    B, N, D = x.shape
    M = B * N
    x2 = x.reshape(M, D)
    gamma2 = gamma.reshape(1, D)
    beta2 = beta.reshape(1, D)
    wb2 = wb.reshape(1, D)

    # ---- pick the token-tile size from a conservative VMEM budget ----
    # Double-buffered input + output tiles plus the resident weight/params must
    # fit under the smallest default scoped-VMEM limit (v5e: 16 MiB); leave
    # headroom.  Tile is a multiple of 8 (f32 sublane) and never exceeds the
    # padded problem size.
    in_bytes = jnp.dtype(x.dtype).itemsize
    out_bytes = in_bytes
    w_bytes = jnp.dtype(w.dtype).itemsize
    budget = 12 * 1024 * 1024
    fixed = D * D * w_bytes + 3 * D * 4                 # W + gamma/beta/bias
    per_row = D * (2 * in_bytes + 2 * out_bytes)        # 2x in buf + 2x out buf
    tm_cap = max(8, (budget - fixed) // max(per_row, 1))
    tm_eff = max(8, _round_down(min(tm, tm_cap, _round_up(M, 8)), 8))

    Mp = _round_up(M, tm_eff)
    if Mp != M:
        # Pad tokens; padded rows produce finite values and are sliced off below.
        x2 = jnp.pad(x2, ((0, Mp - M), (0, 0)))

    grid = (Mp // tm_eff,)

    out = pl.pallas_call(
        prenorm_kernel,
        out_shape=jax.ShapeDtypeStruct((Mp, D), x.dtype),
        grid_spec=pl.GridSpec(
            grid=grid,
            in_specs=[
                pl.BlockSpec((tm_eff, D), lambda i: (i, 0)),  # x tokens (tiled, pipelined)
                pl.BlockSpec((1, D), lambda i: (0, 0)),       # gamma (resident)
                pl.BlockSpec((1, D), lambda i: (0, 0)),       # beta  (resident)
                pl.BlockSpec((D, D), lambda i: (0, 0)),       # W     (resident)
                pl.BlockSpec((1, D), lambda i: (0, 0)),       # fn bias (resident)
            ],
            out_specs=pl.BlockSpec((tm_eff, D), lambda i: (i, 0)),
        ),
        compiler_params=pltpu.CompilerParams(
            # Rows are independent -> shard the token grid across TensorCores.
            dimension_semantics=("parallel",),
        ),
        cost_estimate=pl.CostEstimate(
            flops=2 * Mp * D * D,
            transcendentals=Mp,  # one rsqrt per row
            bytes_accessed=Mp * D * (in_bytes + out_bytes) + D * D * w_bytes + 3 * D * 4,
        ),
    )(x2, gamma2, beta2, w, wb2)

    if Mp != M:
        out = out[:M]
    return out.reshape(B, N, D)


def reference(x, gamma, beta, w, wb):
    mean = jnp.mean(x, axis=-1, keepdims=True)
    var = jnp.mean((x - mean) ** 2, axis=-1, keepdims=True)
    y = (x - mean) / jnp.sqrt(var + EPS) * gamma + beta
    return y @ w + wb


if __name__ == "__main__":
    # Small but lane-friendly shapes: dim = 128 (one full lane width).
    # N chosen non-divisible by the tile so the pad/slice tail path is exercised.
    B, N, D = 2, 56, 128
    key = jax.random.PRNGKey(0)
    kx, kw, kg, kb = jax.random.split(key, 4)

    x = jax.random.normal(kx, (B, N, D), dtype=jnp.float32)

    # Parameters (shapes from nn.LayerNorm(dim) + Linear(dim, dim)); use
    # non-trivial gamma/beta so the affine part of LayerNorm is actually tested.
    gamma = 1.0 + 0.1 * jax.random.normal(kg, (D,), dtype=jnp.float32)
    beta = 0.1 * jax.random.normal(kb, (D,), dtype=jnp.float32)
    w = jax.random.normal(kw, (D, D), dtype=jnp.float32) * 0.02
    wb = jnp.zeros((D,), dtype=jnp.float32)

    # tm=64 -> grid=(2,) on the padded M=128, exercising the pipelined path
    # and the pad/slice tail.
    out = prenorm_linear(x, gamma, beta, w, wb, tm=64)
    out = jax.block_until_ready(out)

    ref = reference(x, gamma, beta, w, wb)
    assert out.shape == (B, N, D)
    assert jnp.allclose(out, ref, atol=1e-4, rtol=1e-4), "mismatch vs reference"

    # Also exercise the default (auto-capped) tile path once.
    out2 = jax.block_until_ready(prenorm_linear(x, gamma, beta, w, wb))
    assert jnp.allclose(out2, ref, atol=1e-4, rtol=1e-4), "mismatch vs reference (default tm)"

    print("KERNEL_OK")
</pallas_src>

<mosaic_0001>
module attributes {stable_mosaic.version = 11 : i64} {
  func.func @prenorm_kernel(%arg0: i32, %arg1: memref<64x128xf32, #tpu.memory_space<vmem>>, %arg2: memref<1x128xf32, #tpu.memory_space<vmem>>, %arg3: memref<1x128xf32, #tpu.memory_space<vmem>>, %arg4: memref<128x128xf32, #tpu.memory_space<vmem>>, %arg5: memref<1x128xf32, #tpu.memory_space<vmem>>, %arg6: memref<64x128xf32, #tpu.memory_space<vmem>>) attributes {dimension_semantics = [#tpu.dimension_semantics<parallel>], iteration_bounds = array<i64: 2>, scalar_prefetch = 0 : i64, scratch_operands = 0 : i64, tpu.core_type = #tpu.core_type<tc>, window_params = [{transform_indices = @transform_0, window_bounds = array<i64: 64, 128>}, {pipeline_mode = #tpu.pipeline_mode<synchronous>, transform_indices = @transform_1, window_bounds = array<i64: 1, 128>}, {pipeline_mode = #tpu.pipeline_mode<synchronous>, transform_indices = @transform_2, window_bounds = array<i64: 1, 128>}, {pipeline_mode = #tpu.pipeline_mode<synchronous>, transform_indices = @transform_3, window_bounds = array<i64: 128, 128>}, {pipeline_mode = #tpu.pipeline_mode<synchronous>, transform_indices = @transform_4, window_bounds = array<i64: 1, 128>}, {transform_indices = @transform_5, window_bounds = array<i64: 64, 128>}]} {
    %c0 = arith.constant 0 : index
    %c0_0 = arith.constant 0 : index
    %0 = vector.load %arg1[%c0, %c0_0] : memref<64x128xf32, #tpu.memory_space<vmem>>, vector<64x128xf32>
    %cst = arith.constant dense<0.000000e+00> : vector<64xf32>
    %1 = vector.multi_reduction <add>, %0, %cst [1] : vector<64x128xf32> to vector<64xf32>
    %2 = vector.shape_cast %1 : vector<64xf32> to vector<64x1xf32>
    %cst_1 = arith.constant 1.280000e+02 : f32
    %3 = vector.broadcast %cst_1 : f32 to vector<64x1xf32>
    %4 = arith.divf %2, %3 : vector<64x1xf32>
    %5 = vector.broadcast %4 : vector<64x1xf32> to vector<64x128xf32>
    %6 = arith.subf %0, %5 : vector<64x128xf32>
    %7 = arith.mulf %6, %6 : vector<64x128xf32>
    %cst_2 = arith.constant dense<0.000000e+00> : vector<64xf32>
    %8 = vector.multi_reduction <add>, %7, %cst_2 [1] : vector<64x128xf32> to vector<64xf32>
    %9 = vector.shape_cast %8 : vector<64xf32> to vector<64x1xf32>
    %cst_3 = arith.constant 1.280000e+02 : f32
    %10 = vector.broadcast %cst_3 : f32 to vector<64x1xf32>
    %11 = arith.divf %9, %10 : vector<64x1xf32>
    %cst_4 = arith.constant 9.99999974E-6 : f32
    %12 = vector.broadcast %cst_4 : f32 to vector<64x1xf32>
    %13 = arith.addf %11, %12 : vector<64x1xf32>
    %14 = math.rsqrt %13 : vector<64x1xf32>
    %15 = vector.broadcast %14 : vector<64x1xf32> to vector<64x128xf32>
    %16 = arith.mulf %6, %15 : vector<64x128xf32>
    %c0_5 = arith.constant 0 : index
    %c0_6 = arith.constant 0 : index
    %17 = vector.load %arg2[%c0_5, %c0_6] : memref<1x128xf32, #tpu.memory_space<vmem>>, vector<1x128xf32>
    %18 = vector.broadcast %17 : vector<1x128xf32> to vector<64x128xf32>
    %19 = arith.mulf %16, %18 : vector<64x128xf32>
    %c0_7 = arith.constant 0 : index
    %c0_8 = arith.constant 0 : index
    %20 = vector.load %arg3[%c0_7, %c0_8] : memref<1x128xf32, #tpu.memory_space<vmem>>, vector<1x128xf32>
    %21 = vector.broadcast %20 : vector<1x128xf32> to vector<64x128xf32>
    %22 = arith.addf %19, %21 : vector<64x128xf32>
    %c0_9 = arith.constant 0 : index
    %c0_10 = arith.constant 0 : index
    %23 = vector.load %arg4[%c0_9, %c0_10] : memref<128x128xf32, #tpu.memory_space<vmem>>, vector<128x128xf32>
    %cst_11 = arith.constant dense<0.000000e+00> : vector<64x128xf32>
    %24 = tpu.matmul %22, %23, %cst_11 {dimension_numbers = #tpu.dot_dimension_numbers<[1], [0], [0], [1], [0, 0, 1, 1], [], []>} : vector<64x128xf32>, vector<128x128xf32>, vector<64x128xf32> -> vector<64x128xf32>
    %c0_12 = arith.constant 0 : index
    %c0_13 = arith.constant 0 : index
    %25 = vector.load %arg5[%c0_12, %c0_13] : memref<1x128xf32, #tpu.memory_space<vmem>>, vector<1x128xf32>
    %26 = vector.broadcast %25 : vector<1x128xf32> to vector<64x128xf32>
    %27 = arith.addf %24, %26 : vector<64x128xf32>
    %c0_14 = arith.constant 0 : index
    %c0_15 = arith.constant 0 : index
    %28 = vector.load %arg6[%c0_14, %c0_15] : memref<64x128xf32, #tpu.memory_space<vmem>>, vector<64x128xf32>
    tpu.vector_store %arg6[%c0_14, %c0_15], %27 {strides = array<i32>} : memref<64x128xf32, #tpu.memory_space<vmem>>, vector<64x128xf32>,
    return
  }
  func.func @transform_0(%arg0: i32) -> (i32, i32) {
    %c0_i32 = arith.constant 0 : i32
    %c0_i32_0 = arith.constant 0 : i32
    return %arg0, %c0_i32 : i32, i32
  }
  func.func @transform_1(%arg0: i32) -> (i32, i32) {
    %c0_i32 = arith.constant 0 : i32
    %c0_i32_0 = arith.constant 0 : i32
    %c0_i32_1 = arith.constant 0 : i32
    return %c0_i32, %c0_i32_0 : i32, i32
  }
  func.func @transform_2(%arg0: i32) -> (i32, i32) {
    %c0_i32 = arith.constant 0 : i32
    %c0_i32_0 = arith.constant 0 : i32
    %c0_i32_1 = arith.constant 0 : i32
    return %c0_i32, %c0_i32_0 : i32, i32
  }
  func.func @transform_3(%arg0: i32) -> (i32, i32) {
    %c0_i32 = arith.constant 0 : i32
    %c0_i32_0 = arith.constant 0 : i32
    %c0_i32_1 = arith.constant 0 : i32
    return %c0_i32, %c0_i32_0 : i32, i32
  }
  func.func @transform_4(%arg0: i32) -> (i32, i32) {
    %c0_i32 = arith.constant 0 : i32
    %c0_i32_0 = arith.constant 0 : i32
    %c0_i32_1 = arith.constant 0 : i32
    return %c0_i32, %c0_i32_0 : i32, i32
  }
  func.func @transform_5(%arg0: i32) -> (i32, i32) {
    %c0_i32 = arith.constant 0 : i32
    %c0_i32_0 = arith.constant 0 : i32
    return %arg0, %c0_i32 : i32, i32
  }
}

</mosaic_0001>

<bundles_post_ra>
// kernel: prenorm_linear.1
= control target key start
LH: loop header
LB: loop body
LE: loop exit
PB: predicated region body
PF: predicated region fallthrough
CT: control target
= control target key end

     0   :  { %s739_s18 = smov 0   ;;  %s860_s0 = inlined_call_operand.vmem [shape: f32[128,128], index: 0, kind: input, shape index: {}]   ;;  %s861_s1 = inlined_call_operand.vmem [shape: f32[1,128], index: 1, kind: input, shape index: {}]   ;;  %s862_s2 = inlined_call_operand.vmem [shape: f32[1,128], index: 2, kind: input, shape index: {}]   ;;  %s863_s3 = inlined_call_operand.vmem [shape: f32[128,128], index: 3, kind: input, shape index: {}]   ;;  %s864_s4 = inlined_call_operand.vmem [shape: f32[1,128], index: 4, kind: input, shape index: {}]   ;;  %s865_s5 = inlined_call_operand.vmem [shape: f32[128,128], index: 5, kind: output, shape index: {}]  }
   0x1 LB: > { %s547_s19 = sadd.s32 4294967295, %s707_s18   ;;  %p551_p0 = scmp.ge.s32.totalorder %s707_s18, 1  ;;  %s707_s18 = sphi %s739_s18, %s15_s18  }
   0x2   : > { %p188_p1 = scmp.lt.s32.totalorder %s707_s18, 3 }
   0x4   : > { %p189_p2 = pnand %p551_p0, %p188_p1 }
   0x5   : > { %s552_s20 = sshll.u32 (!%p189_p2), %s547_s19, 3  ;;  %v355_v8 = vld [vmem:[%s863_s3] sm:$0xff] (!%p189_p2)  ;;  %v356_v9 = vld [vmem:[%s863_s3 + $0x8] sm:$0xff] (!%p189_p2)  ;;  %v357_v10 = vld [vmem:[%s863_s3 + $0x10] sm:$0xff] (!%p189_p2) }
   0x6   : > { %192 = sbr.rel (%p189_p2) target bundleno = 560 (0x230), region = 40  ;;  %p217_p3 = scmp.lt.s32.totalorder (!%p189_p2), %s552_s20, 15  ;;  %v629_v11 = vpack.c.bf16 (!%p189_p2), %v356_v9, %v355_v8  ;;  %v358_v12 = vld [vmem:[%s863_s3 + $0x18] sm:$0xff] (!%p189_p2)  ;;  %v359_v46 = vld [vmem:[%s863_s3 + $0x20] sm:$0xff] (!%p189_p2)  ;;  %v360_v47 = vld [vmem:[%s863_s3 + $0x28] sm:$0xff] (!%p189_p2) }
   0x7   : > { %v633_v13 = vpack.c.bf16 (!%p189_p2), %v358_v12, %v357_v10  ;;  %v637_v48 = vpack.c.bf16 (!%p189_p2), %v360_v47, %v359_v46  ;;  %v361_v49 = vld [vmem:[%s863_s3 + $0x30] sm:$0xff] (!%p189_p2)  ;;  %v362_v50 = vld [vmem:[%s863_s3 + $0x38] sm:$0xff] (!%p189_p2)  ;;  %v363_v52 = vld [vmem:[%s863_s3 + $0x40] sm:$0xff] (!%p189_p2) }
   0x8   : > { %630 = vmatprep.subr.bf16.mxu0 (!%p189_p2), %v629_v11  ;;  %661 = vmatprep.subr.bf16.mxu1 (!%p189_p2), %v629_v11  ;;  %v641_v51 = vpack.c.bf16 (!%p189_p2), %v362_v50, %v361_v49  ;;  %v364_v53 = vld [vmem:[%s863_s3 + $0x48] sm:$0xff] (!%p189_p2)  ;;  %v365_v55 = vld [vmem:[%s863_s3 + $0x50] sm:$0xff] (!%p189_p2)  ;;  %v366_v56 = vld [vmem:[%s863_s3 + $0x58] sm:$0xff] (!%p189_p2) }
   0x9   : > { %632 = vmatpush3.bf16.msra.mxu0 (!%p189_p2), %v629_v11  ;;  %669 = vmatpush3.bf16.msra.mxu1 (!%p189_p2), %v629_v11  ;;  %v645_v54 = vpack.c.bf16 (!%p189_p2), %v364_v53, %v363_v52  ;;  %v649_v57 = vpack.c.bf16 (!%p189_p2), %v366_v56, %v365_v55  ;;  %v367_v58 = vld [vmem:[%s863_s3 + $0x60] sm:$0xff] (!%p189_p2)  ;;  %v368_v59 = vld [vmem:[%s863_s3 + $0x68] sm:$0xff] (!%p189_p2)  ;;  %v369_v61 = vld [vmem:[%s863_s3 + $0x70] sm:$0xff] (!%p189_p2) }
   0xa   : > { %634 = vmatprep.subr.bf16.mxu0 (!%p189_p2), %v633_v13  ;;  %662 = vmatprep.subr.bf16.mxu1 (!%p189_p2), %v633_v13  ;;  %v653_v60 = vpack.c.bf16 (!%p189_p2), %v368_v59, %v367_v58  ;;  %v370_v62 = vld [vmem:[%s863_s3 + $0x78] sm:$0xff] (!%p189_p2) }
   0xb   : > { %v657_v63 = vpack.c.bf16 (!%p189_p2), %v370_v62, %v369_v61 }
   0xd   : > { %s867_s20 = smov (!%p217_p3, %s552_s20), 15  ;;  %636 = vmatpush3.bf16.msra.mxu0 %v633_v13  ;;  %670 = vmatpush3.bf16.msra.mxu1 %v633_v13 }
   0xe   : > { %s553_s21 = sshll.u32 %s867_s20, 3  ;;  %638 = vmatprep.subr.bf16.mxu0 %v637_v48  ;;  %663 = vmatprep.subr.bf16.mxu1 %v637_v48 }
   0xf   : > { %s220_s24 = scalar_lea.vmem %s860_s0, %s553_s21  ;;  %s226_s19 = scalar_lea.vmem %s865_s5, %s553_s21 }
  0x10   : > { %v228_v0 = vld [vmem:[%s220_s24] sm:$0xff]  ;;  %v229_v1 = vld [vmem:[%s220_s24 + $0x8] sm:$0xff]  ;;  %v230_v4 = vld [vmem:[%s220_s24 + $0x10] sm:$0xff] }
  0x11   : > { %236 = vadd.xlane.f32.xlu0 %v228_v0  ;;  %238 = vadd.xlane.f32.xlu1 %v229_v1  ;;  %v232_v2 = vld [vmem:[%s220_s24 + $0x20] sm:$0xff]  ;;  %v233_v3 = vld [vmem:[%s220_s24 + $0x28] sm:$0xff]  ;;  %v234_v5 = vld [vmem:[%s220_s24 + $0x30] sm:$0xff] }
  0x12   : > { %v231_v6 = vld [vmem:[%s220_s24 + $0x18] sm:$0xff]  ;;  %640 = vmatpush3.bf16.msra.mxu0 %v637_v48  ;;  %671 = vmatpush3.bf16.msra.mxu1 %v637_v48 }
  0x13   : > { %v235_v7 = vld [vmem:[%s220_s24 + $0x38] sm:$0xff]  ;;  %642 = vmatprep.subr.bf16.mxu0 %v641_v51  ;;  %664 = vmatprep.subr.bf16.mxu1 %v641_v51 }
  0x15   : > { %244 = vadd.xlane.f32.xlu0 %v232_v2  ;;  %246 = vadd.xlane.f32.xlu1 %v233_v3 }
  0x16   : > { %644 = vmatpush3.bf16.msra.mxu0 %v641_v51  ;;  %672 = vmatpush3.bf16.msra.mxu1 %v641_v51 }
  0x17   : > { %646 = vmatprep.subr.bf16.mxu0 %v645_v54  ;;  %665 = vmatprep.subr.bf16.mxu1 %v645_v54 }
  0x19   : > { %240 = vadd.xlane.f32.xlu0 %v230_v4  ;;  %248 = vadd.xlane.f32.xlu1 %v234_v5 }
  0x1a   : > { %648 = vmatpush3.bf16.msra.mxu0 %v645_v54  ;;  %673 = vmatpush3.bf16.msra.mxu1 %v645_v54 }
  0x1b   : > { %650 = vmatprep.subr.bf16.mxu0 %v649_v57  ;;  %666 = vmatprep.subr.bf16.mxu1 %v649_v57 }
  0x1d   : > { %242 = vadd.xlane.f32.xlu0 %v231_v6  ;;  %250 = vadd.xlane.f32.xlu1 %v235_v7 }
  0x1e   : > { %652 = vmatpush3.bf16.msra.mxu0 %v649_v57  ;;  %674 = vmatpush3.bf16.msra.mxu1 %v649_v57 }
  0x1f   : > { %654 = vmatprep.subr.bf16.mxu0 %v653_v60  ;;  %667 = vmatprep.subr.bf16.mxu1 %v653_v60 }
  0x22   : > { %656 = vmatpush3.bf16.msra.mxu0 %v653_v60  ;;  %675 = vmatpush3.bf16.msra.mxu1 %v653_v60 }
  0x23   : > { %658 = vmatprep.subr.bf16.mxu0 %v657_v63  ;;  %668 = vmatprep.subr.bf16.mxu1 %v657_v63 }
  0x26   : > { %660 = vmatpush3.bf16.msra.mxu0 %v657_v63  ;;  %676 = vmatpush3.bf16.msra.mxu1 %v657_v63 }
  0x9e   : > { %v237_v14 = vpop.xlane.xlu0 %236  ;;  %v239_v15 = vpop.xlane.xlu1 %238 }
  0x9f   : > { %v253_v16 = vmul.f32 0.0078125, %v237_v14  ;;  %v254_v17 = vmul.f32 0.0078125, %v239_v15 }
  0xa1   : > { %v767_v18 = vsub.f32 %v228_v0, %v253_v16  ;;  %v769_v19 = vsub.f32 %v229_v1, %v254_v17 }
  0xa2   : > { %v245_v20 = vpop.xlane.xlu0 %244  ;;  %v247_v21 = vpop.xlane.xlu1 %246 }
  0xa3   : > { %v257_v22 = vmul.f32 0.0078125, %v245_v20  ;;  %v269_v23 = vmul.f32 %v767_v18, %v767_v18  ;;  %v258_v24 = vmul.f32 0.0078125, %v247_v21  ;;  %v270_v27 = vmul.f32 %v769_v19, %v769_v19 }
  0xa5   : > { %v773_v25 = vsub.f32 %v232_v2, %v257_v22  ;;  %277 = vadd.xlane.f32.xlu0 %v269_v23  ;;  %v775_v26 = vsub.f32 %v233_v3, %v258_v24  ;;  %v556_v24 = vld [vmem:[%s861_s1] ss:$0 sm:$0xff] }
  0xa6   : > { %v241_v28 = vpop.xlane.xlu0 %240  ;;  %v249_v29 = vpop.xlane.xlu1 %248 }
  0xa7   : > { %v255_v30 = vmul.f32 0.0078125, %v241_v28  ;;  %v273_v31 = vmul.f32 %v773_v25, %v773_v25  ;;  %v259_v32 = vmul.f32 0.0078125, %v249_v29  ;;  %v274_v35 = vmul.f32 %v775_v26, %v775_v26 }
  0xa9   : > { %v781_v33 = vsub.f32 %v230_v4, %v255_v30  ;;  %279 = vadd.xlane.f32.xlu0 %v270_v27  ;;  %285 = vadd.xlane.f32.xlu1 %v273_v31  ;;  %v783_v34 = vsub.f32 %v234_v5, %v259_v32  ;;  %v557_v30 = vld [vmem:[%s862_s2] ss:$0 sm:$0xff] }
  0xaa   : > { %v243_v36 = vpop.xlane.xlu0 %242  ;;  %v251_v37 = vpop.xlane.xlu1 %250 }
  0xab   : > { %v256_v38 = vmul.f32 0.0078125, %v243_v36  ;;  %v271_v39 = vmul.f32 %v781_v33, %v781_v33  ;;  %v260_v40 = vmul.f32 0.0078125, %v251_v37  ;;  %v275_v43 = vmul.f32 %v783_v34, %v783_v34 }
  0xad   : > { %v789_v41 = vsub.f32 %v231_v6, %v256_v38  ;;  %287 = vadd.xlane.f32.xlu1 %v274_v35  ;;  %281 = vadd.xlane.f32.xlu0 %v271_v39  ;;  %v791_v42 = vsub.f32 %v235_v7, %v260_v40 }
  0xaf   : > { %v272_v44 = vmul.f32 %v789_v41, %v789_v41  ;;  %v276_v45 = vmul.f32 %v791_v42, %v791_v42 }
  0xb1   : > { %289 = vadd.xlane.f32.xlu1 %v275_v43  ;;  %283 = vadd.xlane.f32.xlu0 %v272_v44 }
  0xb5   : > { %291 = vadd.xlane.f32.xlu1 %v276_v45 }
 0x132   : > { %v278_v0 = vpop.xlane.xlu0 %277 }
 0x133   : > { %v293_v1 = vmul.f32 0.0078125, %v278_v0 }
 0x135   : > { %v301_v2 = vadd.f32 1e-05, %v293_v1 }
 0x136   : > { %v286_v3 = vpop.xlane.xlu1 %285  ;;  %v280_v4 = vpop.xlane.xlu0 %279 }
 0x137   : > { %685 = vrsqrt.f32 %v301_v2  ;;  %v297_v5 = vmul.f32 0.0078125, %v286_v3  ;;  %v294_v6 = vmul.f32 0.0078125, %v280_v4 }
 0x139   : > { %v305_v7 = vadd.f32 1e-05, %v297_v5  ;;  %v302_v8 = vadd.f32 1e-05, %v294_v6 }
 0x13a   : > { %v288_v9 = vpop.xlane.xlu1 %287  ;;  %v282_v10 = vpop.xlane.xlu0 %281 }
 0x13b   : > { %687 = vrsqrt.f32 %v305_v7  ;;  %v298_v11 = vmul.f32 0.0078125, %v288_v9  ;;  %v295_v12 = vmul.f32 0.0078125, %v282_v10 }
 0x13c   : > { %689 = vrsqrt.f32 %v302_v8 }
 0x13d   : > { %v306_v13 = vadd.f32 1e-05, %v298_v11  ;;  %v303_v14 = vadd.f32 1e-05, %v295_v12 }
 0x13e   : > { %v290_v15 = vpop.xlane.xlu1 %289  ;;  %v284_v16 = vpop.xlane.xlu0 %283 }
 0x13f   : > { %691 = vrsqrt.f32 %v306_v13  ;;  %v299_v17 = vmul.f32 0.0078125, %v290_v15  ;;  %v296_v20 = vmul.f32 0.0078125, %v284_v16 }
 0x140   : > { %693 = vrsqrt.f32 %v303_v14 }
 0x141   : > { %v686_v21 = vpop.eup %685  ;;  %v307_v22 = vadd.f32 1e-05, %v299_v17  ;;  %v304_v23 = vadd.f32 1e-05, %v296_v20 }
 0x142   : > { %v292_v27 = vpop.xlane.xlu1 %291  ;;  %v317_v28 = vmul.f32 %v686_v21, %v767_v18 }
 0x143   : > { %695 = vrsqrt.f32 %v307_v22  ;;  %v300_v29 = vmul.f32 0.0078125, %v292_v27 }
 0x144   : > { %697 = vrsqrt.f32 %v304_v23  ;;  %v332_v31 = vmul.f32 %v556_v24, %v317_v28 }
 0x145   : > { %v688_v32 = vpop.eup %687  ;;  %v308_v35 = vadd.f32 1e-05, %v300_v29 }
 0x146   : > { %v690_v36 = vpop.eup %689  ;;  %v347_v37 = vadd.f32 %v557_v30, %v332_v31  ;;  %v321_v38 = vmul.f32 %v688_v32, %v773_v25 }
 0x147   : > { %699 = vrsqrt.f32 %v308_v35  ;;  %v318_v39 = vmul.f32 %v690_v36, %v769_v19 }
 0x148   : > { %617 = vmatprep.mubr.f32.mxu0 %v347_v37  ;;  %v336_v40 = vmul.f32 %v556_v24, %v321_v38 }
 0x149   : > { %v692_v18 = vpop.eup %691  ;;  %v333_v43 = vmul.f32 %v556_v24, %v318_v39 }
 0x14a   : > { %v694_v44 = vpop.eup %693  ;;  %v351_v45 = vadd.f32 %v557_v30, %v336_v40  ;;  %v322_v46 = vmul.f32 %v692_v18, %v775_v26 }
 0x14b   : > { %v348_v47 = vadd.f32 %v557_v30, %v333_v43  ;;  %v319_v48 = vmul.f32 %v694_v44, %v781_v33 }
 0x14c   : > { %623 = vmatprep.mubr.f32.mxu1 %v351_v45  ;;  %v337_v49 = vmul.f32 %v556_v24, %v322_v46 }
 0x14d   : > { %v696_v50 = vpop.eup %695  ;;  %618 = vmatmul.mubr.f32.vlgmr.msra.gmra.mrb[0].mxu0 %v348_v47  ;;  %v334_v51 = vmul.f32 %v556_v24, %v319_v48 }
 0x14e   : > { %v698_v25 = vpop.eup %697  ;;  %v352_v52 = vadd.f32 %v557_v30, %v337_v49  ;;  %v323_v19 = vmul.f32 %v696_v50, %v783_v34  ;;  %v558_v34 = vld [vmem:[%s864_s4] ss:$0 sm:$0xff] }
 0x14f   : > { %v349_v53 = vadd.f32 %v557_v30, %v334_v51  ;;  %v320_v54 = vmul.f32 %v698_v25, %v789_v41 }
 0x150   : > { %624 = vmatmul.mubr.f32.vlgmr.msra.gmra.mrb[0].mxu1 %v352_v52  ;;  %v338_v55 = vmul.f32 %v556_v24, %v323_v19 }
 0x151   : > { %v700_v56 = vpop.eup %699  ;;  %620 = vmatprep.mubr.f32.mxu0 %v349_v53  ;;  %v335_v26 = vmul.f32 %v556_v24, %v320_v54 }
 0x152   : > { %v353_v57 = vadd.f32 %v557_v30, %v338_v55  ;;  %v324_v33 = vmul.f32 %v700_v56, %v791_v42 }
 0x153   : > { %v350_v58 = vadd.f32 %v557_v30, %v335_v26 }
 0x154   : > { %626 = vmatprep.mubr.f32.mxu1 %v353_v57  ;;  %v339_v59 = vmul.f32 %v556_v24, %v324_v33 }
 0x155   : > { %621 = vmatmul.mubr.f32.gmra.mrb[2].mxu0 %v350_v58 }
 0x156   : > { %v354_v60 = vadd.f32 %v557_v30, %v339_v59 }
 0x158   : > { %627 = vmatmul.mubr.f32.gmra.mrb[2].mxu1 %v354_v60 }
 0x220   : > { %v619_v41 = vpop.f32.mrb[0].mxu0 }
 0x221   : > { %v450_v61 = vadd.f32 %v619_v41, %v558_v34  ;;  %v444_v62 = vpop.f32.mrb[1].mxu0 }
 0x222   : > { %v445_v63 = vadd.f32 %v558_v34, %v444_v62 }
 0x223   : > { %484 = vst [vmem:[%s226_s19 + $0x8] sm:$0xff] %v450_v61  ;;  %v625_v42 = vpop.f32.mrb[0].mxu1 }
 0x224   : > { %483 = vst [vmem:[%s226_s19] sm:$0xff] %v445_v63  ;;  %v470_v0 = vadd.f32 %v625_v42, %v558_v34  ;;  %v464_v1 = vpop.f32.mrb[1].mxu1 }
 0x225   : > { %v465_v2 = vadd.f32 %v558_v34, %v464_v1 }
 0x226   : > { %488 = vst [vmem:[%s226_s19 + $0x28] sm:$0xff] %v470_v0 }
 0x227   : > { %487 = vst [vmem:[%s226_s19 + $0x20] sm:$0xff] %v465_v2 }
 0x228   : > { %v622_v3 = vpop.f32.mrb[2].mxu0 }
 0x229   : > { %v460_v4 = vadd.f32 %v622_v3, %v558_v34  ;;  %v454_v5 = vpop.f32.mrb[3].mxu0 }
 0x22a   : > { %v455_v6 = vadd.f32 %v558_v34, %v454_v5 }
 0x22b   : > { %486 = vst [vmem:[%s226_s19 + $0x18] sm:$0xff] %v460_v4  ;;  %v628_v7 = vpop.f32.mrb[2].mxu1 }
 0x22c   : > { %485 = vst [vmem:[%s226_s19 + $0x10] sm:$0xff] %v455_v6  ;;  %v480_v8 = vadd.f32 %v628_v7, %v558_v34  ;;  %v474_v9 = vpop.f32.mrb[3].mxu1 }
 0x22d   : > { %v475_v10 = vadd.f32 %v558_v34, %v474_v9 }
 0x22e   : > { %490 = vst [vmem:[%s226_s19 + $0x38] sm:$0xff] %v480_v8 }
 0x22f   : > { %489 = vst [vmem:[%s226_s19 + $0x30] sm:$0xff] %v475_v10 }
 0x230 PF: > { %s15_s18 = sadd.s32 1, %s707_s18  }
 0x231   : > { %p12_p4 = scmp.ge.s32.totalorder %s15_s18, 4  }
 0x233   :  { %14 = sbr.rel (!%p12_p4) target bundleno = 1 (0x1), region = 70 }

</bundles_post_ra>
